<compile_context>
chip_gen: v5e
topology: v5e:2x2
jax: 0.10.0
libtpu: 0.0.40
codegen_flags: <defaults>
</compile_context>

<pallas_src>
import functools
import math

import jax
import jax.numpy as jnp
from jax import lax
from jax.experimental import pallas as pl
from jax.experimental.pallas import tpu as pltpu


def _round_up(x, m):
    return (x + m - 1) // m * m


def _ntxent_bounded_kernel(reps_ref, pos_ref, corr_ref, out_ref, acc_ref, *,
                           tm, tn, n_col_tiles, m_max, exp_dtype, unroll):
    """Cosine-similarity path: every logit <= m_max, so no online max is needed.

    grid = (row_tiles,).  Column tiles are an in-kernel loop.  The diagonal and
    padded-column exp() mass is subtracted analytically via corr_ref, so the hot
    loop is just: matmul -> subtract constant -> exp -> lane-dense accumulate.
    """
    r0 = pl.multiple_of(pl.program_id(0) * tm, tm)
    q = reps_ref[pl.ds(r0, tm), :]                       # (tm, d_pad), loaded once
    acc_ref[...] = jnp.zeros_like(acc_ref)

    def col_step(j, carry):
        c0 = pl.multiple_of(j * tn, tn)
        k = reps_ref[pl.ds(c0, tn), :]                   # (tn, d_pad)
        # Both operands contract on their last (lane) dim -> no in-kernel transpose.
        s = lax.dot_general(q, k, dimension_numbers=(((1,), (1,)), ((), ())),
                            preferred_element_type=jnp.float32)   # (tm, tn)
        e = jnp.exp((s - m_max).astype(exp_dtype))       # bf16 exp on v6e/v7x path
        acc_ref[...] = acc_ref[...] + e.astype(jnp.float32)
        return carry

    lax.fori_loop(0, n_col_tiles, col_step, 0, unroll=unroll)

    # Single lane reduction per row tile; remove diag + padded-column mass.
    l = jnp.sum(acc_ref[...], axis=-1, keepdims=True)    # (tm, 1)
    l = jnp.maximum(l - corr_ref[...], 1e-30)
    out_ref[...] = m_max + jnp.log(l) - pos_ref[...]


def _ntxent_online_kernel(reps_ref, pos_ref, out_ref, m_ref, l_ref, *,
                          tm, tn, n_col_tiles, n_valid, unroll):
    """Dot-similarity path: unbounded logits -> masked online logsumexp."""
    r0 = pl.multiple_of(pl.program_id(0) * tm, tm)
    q = reps_ref[pl.ds(r0, tm), :]
    m_ref[...] = jnp.full(m_ref.shape, -1e30, dtype=jnp.float32)
    l_ref[...] = jnp.zeros_like(l_ref)
    grow = r0 + lax.broadcasted_iota(jnp.int32, (tm, tn), 0)   # hoisted out of loop

    def col_step(j, carry):
        c0 = pl.multiple_of(j * tn, tn)
        k = reps_ref[pl.ds(c0, tn), :]
        s = lax.dot_general(q, k, dimension_numbers=(((1,), (1,)), ((), ())),
                            preferred_element_type=jnp.float32)
        gcol = c0 + lax.broadcasted_iota(jnp.int32, (tm, tn), 1)
        invalid = jnp.logical_or(grow == gcol, gcol >= n_valid)
        s_m = jnp.where(invalid, -1e30, s)
        m_prev = m_ref[...]
        m_new = jnp.maximum(m_prev, jnp.max(s_m, axis=-1, keepdims=True))
        l_ref[...] = (jnp.exp(m_prev - m_new) * l_ref[...]
                      + jnp.sum(jnp.exp(s_m - m_new), axis=-1, keepdims=True))
        m_ref[...] = m_new
        return carry

    lax.fori_loop(0, n_col_tiles, col_step, 0, unroll=unroll)
    out_ref[...] = m_ref[...] + jnp.log(l_ref[...]) - pos_ref[...]


def ntxent_loss(zis, zjs, *, temperature=0.5, use_cosine_similarity=True,
                compute_dtype=jnp.bfloat16, block_rows=None, block_cols=None):
    """NT-Xent loss matching NTXentLoss(temperature, use_cosine_similarity)(zis, zjs)."""
    assert zis.shape == zjs.shape and zis.ndim == 2
    b, d = zis.shape
    n = 2 * b
    compute_dtype = jnp.dtype(compute_dtype)

    # ---- cheap O(N*D) prep in the wrapper -----------------------------------
    reps = jnp.concatenate([zjs, zis], axis=0).astype(jnp.float32)       # (N, D)
    if use_cosine_similarity:
        # torch CosineSimilarity clamps ||x||*||y|| at 1e-8; a per-row clamp of
        # ||x||^2 is identical except for degenerate near-zero-norm rows.
        inv_norm = lax.rsqrt(jnp.maximum(
            jnp.sum(reps * reps, axis=-1, keepdims=True), 1e-8))
        reps = reps * inv_norm
    reps = reps * (1.0 / math.sqrt(temperature))          # fold 1/temperature

    # Cast once; compute pos / diag from the cast values so the finalize-time
    # corrections match what the MXU actually accumulates.
    reps_c = reps.astype(compute_dtype)
    reps_f = reps_c.astype(jnp.float32)
    pos = jnp.sum(reps_f * jnp.roll(reps_f, -b, axis=0), axis=-1, keepdims=True)

    # ---- tile sizing ---------------------------------------------------------
    sub = 16 if compute_dtype == jnp.dtype(jnp.bfloat16) else 8
    if block_rows is None or block_cols is None:
        if n <= 1024:
            tn = _round_up(n, 128)                 # one column pass
            tm = min(128, _round_up(n, sub))       # >=2 row tiles once n > 128
        else:
            tm = 256
            tn = 2048 if n >= 4096 else 1024       # large col tiles, cheap f32 temp
    else:
        tm, tn = int(block_rows), int(block_cols)
    assert tm % 8 == 0 and tn % 8 == 0

    d_pad = _round_up(max(d, 128), 128)            # lanes / MXU contraction dim
    n_rows = _round_up(n, tm)                      # rows covered by the grid
    n_cols = _round_up(n, tn)                      # cols covered by in-kernel loop
    n_reps = max(n_rows, n_cols)                   # physical rows of padded reps
    n_col_tiles = n_cols // tn
    unroll = bool(n_col_tiles <= 8)

    reps_p = jnp.pad(reps_c, ((0, n_reps - n), (0, d_pad - d)))
    pos_p = jnp.pad(pos, ((0, n_rows - n), (0, 0)))

    # ---- VMEM budget ---------------------------------------------------------
    tile_bytes = tm * tn * 4
    vmem_needed = (n_reps * d_pad * compute_dtype.itemsize   # resident reps
                   + 6 * tile_bytes                          # acc + s/e temporaries
                   + 16 * tm * 4                             # (tm,1) row blocks
                   + (2 << 20))
    vmem_limit = int(min(max(vmem_needed, 32 * 1024 * 1024), 64 * 1024 * 1024))
    # TODO(synk): for very large N (resident reps > ~48 MiB, matters first on
    # v7x's 64 MiB/TC) switch the K operand to a BlockSpec-tiled input instead
    # of whole-array VMEM residency.
    cparams = pltpu.CompilerParams(dimension_semantics=("parallel",),
                                   vmem_limit_bytes=vmem_limit)
    grid = (n_rows // tm,)

    if use_cosine_similarity:
        # Bounded-logit fast path: fixed max m = 1/temperature; diag + padded
        # columns removed analytically (padded reps rows are zero -> logit 0).
        m_max = 1.0 / float(temperature)
        exp_dtype = (jnp.bfloat16 if compute_dtype == jnp.dtype(jnp.bfloat16)
                     else jnp.float32)
        diag = jnp.sum(reps_f * reps_f, axis=-1, keepdims=True)
        corr = jnp.exp(diag - m_max) + (n_cols - n) * math.exp(-m_max)
        corr_p = jnp.pad(corr, ((0, n_rows - n), (0, 0)))

        kernel = functools.partial(
            _ntxent_bounded_kernel, tm=tm, tn=tn, n_col_tiles=n_col_tiles,
            m_max=m_max, exp_dtype=exp_dtype, unroll=unroll)
        per_row = pl.pallas_call(
            kernel,
            out_shape=jax.ShapeDtypeStruct((n_rows, 1), jnp.float32),
            grid_spec=pltpu.PrefetchScalarGridSpec(
                num_scalar_prefetch=0,
                grid=grid,
                in_specs=[
                    pl.BlockSpec(memory_space=pltpu.MemorySpace.VMEM),  # reps resident
                    pl.BlockSpec((tm, 1), lambda i: (i, 0)),            # pos
                    pl.BlockSpec((tm, 1), lambda i: (i, 0)),            # corr
                ],
                out_specs=pl.BlockSpec((tm, 1), lambda i: (i, 0)),
                scratch_shapes=[pltpu.VMEM((tm, tn), jnp.float32)],     # lane-dense acc
            ),
            compiler_params=cparams,
        )(reps_p, pos_p, corr_p)
    else:
        # Unbounded (dot-similarity) path: robust masked online logsumexp.
        kernel = functools.partial(
            _ntxent_online_kernel, tm=tm, tn=tn, n_col_tiles=n_col_tiles,
            n_valid=n, unroll=unroll)
        per_row = pl.pallas_call(
            kernel,
            out_shape=jax.ShapeDtypeStruct((n_rows, 1), jnp.float32),
            grid_spec=pltpu.PrefetchScalarGridSpec(
                num_scalar_prefetch=0,
                grid=grid,
                in_specs=[
                    pl.BlockSpec(memory_space=pltpu.MemorySpace.VMEM),  # reps resident
                    pl.BlockSpec((tm, 1), lambda i: (i, 0)),            # pos
                ],
                out_specs=pl.BlockSpec((tm, 1), lambda i: (i, 0)),
                scratch_shapes=[pltpu.VMEM((tm, 1), jnp.float32),       # running max
                                pltpu.VMEM((tm, 1), jnp.float32)],      # running sum
            ),
            compiler_params=cparams,
        )(reps_p, pos_p)

    return jnp.sum(per_row[:n]) / jnp.float32(n)


def _ntxent_ref(zis, zjs, temperature, use_cosine):
    """Pure-JAX mirror of the PyTorch module semantics (for verification)."""
    b = zis.shape[0]
    reps = jnp.concatenate([zjs, zis], axis=0).astype(jnp.float32)
    dots = jnp.dot(reps, reps.T, precision=jax.lax.Precision.HIGHEST)
    if use_cosine:
        nrm = jnp.linalg.norm(reps, axis=-1, keepdims=True)
        sim = dots / jnp.maximum(nrm * nrm.T, 1e-8)
    else:
        sim = dots
    n = 2 * b
    l_pos = jnp.diagonal(sim, offset=b)
    r_pos = jnp.diagonal(sim, offset=-b)
    positives = jnp.concatenate([l_pos, r_pos]).reshape(n, 1)
    keep = ~(jnp.eye(n, dtype=bool) | jnp.eye(n, k=b, dtype=bool)
             | jnp.eye(n, k=-b, dtype=bool))
    negatives = sim[keep].reshape(n, n - 2)
    logits = jnp.concatenate([positives, negatives], axis=1) / temperature
    lse = jax.nn.logsumexp(logits, axis=-1)
    return jnp.sum(lse - logits[:, 0]) / n


if __name__ == "__main__":
    temperature = 0.5
    key = jax.random.PRNGKey(0)
    k1, k2, k3, k4 = jax.random.split(key, 4)

    # Small shapes consistent with the module (flat embeddings).
    B, D = 8, 32
    zis = jax.random.normal(k1, (B, D), dtype=jnp.float32)
    zjs = jax.random.normal(k2, (B, D), dtype=jnp.float32)

    # 1) f32 compute path: tight-ish check of kernel logic vs reference.
    for use_cos in (True, False):
        got = jax.block_until_ready(ntxent_loss(
            zis, zjs, temperature=temperature, use_cosine_similarity=use_cos,
            compute_dtype=jnp.float32))
        ref = _ntxent_ref(zis, zjs, temperature, use_cos)
        assert jnp.allclose(got, ref, rtol=1e-3, atol=1e-3), (use_cos, got, ref)

    # 2) default bf16 MXU + bf16-exp path: loose tolerance for bf16 drift.
    for use_cos in (True, False):
        got = jax.block_until_ready(ntxent_loss(
            zis, zjs, temperature=temperature, use_cosine_similarity=use_cos))
        ref = _ntxent_ref(zis, zjs, temperature, use_cos)
        assert jnp.allclose(got, ref, rtol=5e-2, atol=5e-2), (use_cos, got, ref)

    # 3) multi-tile path (forced small tiles) exercising the in-kernel column
    #    loop, row/col/feature padding, the diag/pad corrections (cosine path)
    #    and the masked online logsumexp (dot path).
    B2, D2 = 40, 24                     # N = 80 -> rows pad 80, cols pad 96
    zis2 = jax.random.normal(k3, (B2, D2), dtype=jnp.float32)
    zjs2 = jax.random.normal(k4, (B2, D2), dtype=jnp.float32)
    for use_cos in (True, False):
        got = jax.block_until_ready(ntxent_loss(
            zis2, zjs2, temperature=temperature, use_cosine_similarity=use_cos,
            compute_dtype=jnp.float32, block_rows=16, block_cols=32))
        ref = _ntxent_ref(zis2, zjs2, temperature, use_cos)
        assert jnp.allclose(got, ref, rtol=1e-3, atol=1e-3), (use_cos, got, ref)

    print("KERNEL_OK")
</pallas_src>

<mosaic_0001>
module attributes {stable_mosaic.version = 11 : i64} {
  func.func @_ntxent_bounded_kernel(%arg0: i32, %arg1: memref<128x128xf32, #tpu.memory_space<vmem>>, %arg2: memref<16x1xf32, #tpu.memory_space<vmem>>, %arg3: memref<16x1xf32, #tpu.memory_space<vmem>>, %arg4: memref<16x1xf32, #tpu.memory_space<vmem>>, %arg5: memref<16x128xf32, #tpu.memory_space<vmem>>) attributes {dimension_semantics = [#tpu.dimension_semantics<parallel>], iteration_bounds = array<i64: 1>, scalar_prefetch = 0 : i64, scratch_operands = 1 : i64, tpu.core_type = #tpu.core_type<tc>, window_params = [{pipeline_mode = #tpu.pipeline_mode<synchronous>, transform_indices = @transform_0, window_bounds = array<i64: 128, 128>}, {transform_indices = @transform_1, window_bounds = array<i64: 16, 1>}, {transform_indices = @transform_2, window_bounds = array<i64: 16, 1>}, {transform_indices = @transform_3, window_bounds = array<i64: 16, 1>}]} {
    %c16_i32 = arith.constant 16 : i32
    %0 = arith.muli %arg0, %c16_i32 : i32
    %1 = tpu.assume_multiple %0, 16 : i32
    %2 = arith.index_cast %1 : i32 to index
    %c0 = arith.constant 0 : index
    %3 = vector.load %arg1[%2, %c0] : memref<128x128xf32, #tpu.memory_space<vmem>>, vector<16x128xf32>
    %cst = arith.constant 0.000000e+00 : f32
    %4 = vector.broadcast %cst : f32 to vector<16x128xf32>
    %c0_0 = arith.constant 0 : index
    %c0_1 = arith.constant 0 : index
    %5 = vector.load %arg5[%c0_0, %c0_1] : memref<16x128xf32, #tpu.memory_space<vmem>>, vector<16x128xf32>
    tpu.vector_store %arg5[%c0_0, %c0_1], %4 {strides = array<i32>} : memref<16x128xf32, #tpu.memory_space<vmem>>, vector<16x128xf32>,
    %c0_i32 = arith.constant 0 : i32
    %c128_i32 = arith.constant 128 : i32
    %6 = arith.muli %c0_i32, %c128_i32 : i32
    %7 = tpu.assume_multiple %6, 128 : i32
    %8 = arith.index_cast %7 : i32 to index
    %c0_2 = arith.constant 0 : index
    %9 = vector.load %arg1[%8, %c0_2] : memref<128x128xf32, #tpu.memory_space<vmem>>, vector<128x128xf32>
    %cst_3 = arith.constant dense<0.000000e+00> : vector<16x128xf32>
    %10 = tpu.matmul %3, %9, %cst_3 {dimension_numbers = #tpu.dot_dimension_numbers<[1], [1], [0], [0], [0, 0, 1, 0], [], []>} : vector<16x128xf32>, vector<128x128xf32>, vector<16x128xf32> -> vector<16x128xf32>
    %cst_4 = arith.constant 2.000000e+00 : f32
    %11 = vector.broadcast %cst_4 : f32 to vector<16x128xf32>
    %12 = arith.subf %10, %11 : vector<16x128xf32>
    %13 = math.exp %12 : vector<16x128xf32>
    %c0_5 = arith.constant 0 : index
    %c0_6 = arith.constant 0 : index
    %14 = vector.load %arg5[%c0_5, %c0_6] : memref<16x128xf32, #tpu.memory_space<vmem>>, vector<16x128xf32>
    %15 = arith.addf %14, %13 : vector<16x128xf32>
    %c0_7 = arith.constant 0 : index
    %c0_8 = arith.constant 0 : index
    %16 = vector.load %arg5[%c0_7, %c0_8] : memref<16x128xf32, #tpu.memory_space<vmem>>, vector<16x128xf32>
    tpu.vector_store %arg5[%c0_7, %c0_8], %15 {strides = array<i32>} : memref<16x128xf32, #tpu.memory_space<vmem>>, vector<16x128xf32>,
    %c1_i32 = arith.constant 1 : i32
    %c0_9 = arith.constant 0 : index
    %c0_10 = arith.constant 0 : index
    %17 = vector.load %arg5[%c0_9, %c0_10] : memref<16x128xf32, #tpu.memory_space<vmem>>, vector<16x128xf32>
    %cst_11 = arith.constant dense<0.000000e+00> : vector<16xf32>
    %18 = vector.multi_reduction <add>, %17, %cst_11 [1] : vector<16x128xf32> to vector<16xf32>
    %19 = vector.shape_cast %18 : vector<16xf32> to vector<16x1xf32>
    %c0_12 = arith.constant 0 : index
    %c0_13 = arith.constant 0 : index
    %20 = vector.load %arg3[%c0_12, %c0_13] : memref<16x1xf32, #tpu.memory_space<vmem>>, vector<16x1xf32>
    %21 = arith.subf %19, %20 : vector<16x1xf32>
    %cst_14 = arith.constant 1.000000e-30 : f32
    %22 = vector.broadcast %cst_14 : f32 to vector<16x1xf32>
    %23 = arith.maximumf %21, %22 : vector<16x1xf32>
    %24 = math.log %23 : vector<16x1xf32>
    %cst_15 = arith.constant 2.000000e+00 : f32
    %25 = vector.broadcast %cst_15 : f32 to vector<16x1xf32>
    %26 = arith.addf %25, %24 : vector<16x1xf32>
    %c0_16 = arith.constant 0 : index
    %c0_17 = arith.constant 0 : index
    %27 = vector.load %arg2[%c0_16, %c0_17] : memref<16x1xf32, #tpu.memory_space<vmem>>, vector<16x1xf32>
    %28 = arith.subf %26, %27 : vector<16x1xf32>
    %c0_18 = arith.constant 0 : index
    %c0_19 = arith.constant 0 : index
    %29 = vector.load %arg4[%c0_18, %c0_19] : memref<16x1xf32, #tpu.memory_space<vmem>>, vector<16x1xf32>
    tpu.vector_store %arg4[%c0_18, %c0_19], %28 {strides = array<i32>} : memref<16x1xf32, #tpu.memory_space<vmem>>, vector<16x1xf32>,
    return
  }
  func.func @transform_0(%arg0: i32) -> (i32, i32) {
    %c0_i32 = arith.constant 0 : i32
    %c0_i32_0 = arith.constant 0 : i32
    %c0_i32_1 = arith.constant 0 : i32
    return %c0_i32, %c0_i32_0 : i32, i32
  }
  func.func @transform_1(%arg0: i32) -> (i32, i32) {
    %c0_i32 = arith.constant 0 : i32
    %c0_i32_0 = arith.constant 0 : i32
    return %arg0, %c0_i32 : i32, i32
  }
  func.func @transform_2(%arg0: i32) -> (i32, i32) {
    %c0_i32 = arith.constant 0 : i32
    %c0_i32_0 = arith.constant 0 : i32
    return %arg0, %c0_i32 : i32, i32
  }
  func.func @transform_3(%arg0: i32) -> (i32, i32) {
    %c0_i32 = arith.constant 0 : i32
    %c0_i32_0 = arith.constant 0 : i32
    return %arg0, %c0_i32 : i32, i32
  }
}

</mosaic_0001>

<bundles_post_ra>
// kernel: tpu_custom_call.1
= control target key start
LH: loop header
LB: loop body
LE: loop exit
PB: predicated region body
PF: predicated region fallthrough
CT: control target
= control target key end

     0   :  { %8 = vsyncpa [#allocation4], 0  ;;  %s172_s15 = smov [#allocation3]   ;;  %s173_s17 = smov 128   ;;  %s216_s0 = inlined_call_operand.hbm [shape: f32[128,128], index: 0, kind: input, shape index: {}]   ;;  %s217_s1 = inlined_call_operand.vmem [shape: f32[16,1], index: 1, kind: input, shape index: {}]   ;;  %s218_s2 = inlined_call_operand.vmem [shape: f32[16,1], index: 2, kind: input, shape index: {}]   ;;  %s219_s3 = inlined_call_operand.vmem [shape: f32[16,1], index: 3, kind: output, shape index: {}]  }
   0x1   :  { %s13_s14 = sshll.u32 %s216_s0, 4  ;;  %s15_s16 = sshll.u32 %s172_s15, 4  ;;  %s14_s14 = int_to_ptr.hbm [resolvable:$true] %s13_s14  ;;  %s16_s16 = int_to_ptr.vmem [resolvable:$true] %s15_s16 }
   0x2   :  { %s174_s18 = smov 8  }
   0x3   :  { %21 = dma.hbm_to_vmem [thread:$0]  %s14_s14, 2048, %s16_s16, [#allocation4], %s173_s17, %s173_s17, %s174_s18  }
   0x4   :  { %170 = dma.done.wait [#allocation4], 2048  }
   0x5   :  { %171 = vsyncadd [#allocation4], 4294965248  ;;  %v51_v0 = vld [vmem:[#allocation3 + $0x78] sm:$0xff]  ;;  %v50_v1 = vld [vmem:[#allocation3 + $0x70] sm:$0xff]  ;;  %vm109_vm0 = vcmask 7168  }
   0x6   :  { %52 = vmatpush.xpose.msra.mxu0 %v51_v0  ;;  %119 = vmatpush.xpose.msra.mxu1 %v51_v0  ;;  %v49_v2 = vld [vmem:[#allocation3 + $0x68] sm:$0xff]  ;;  %v48_v3 = vld [vmem:[#allocation3 + $0x60] sm:$0xff]  ;;  %v47_v4 = vld [vmem:[#allocation3 + $0x58] sm:$0xff] }
   0x7   :  { %v46_v5 = vld [vmem:[#allocation3 + $0x50] sm:$0xff]  ;;  %v45_v6 = vld [vmem:[#allocation3 + $0x48] sm:$0xff]  ;;  %v44_v7 = vld [vmem:[#allocation3 + $0x40] sm:$0xff] }
   0x8   :  { %v43_v8 = vld [vmem:[#allocation3 + $0x38] sm:$0xff]  ;;  %v42_v9 = vld [vmem:[#allocation3 + $0x30] sm:$0xff]  ;;  %v41_v10 = vld [vmem:[#allocation3 + $0x28] sm:$0xff] }
   0x9   :  { %v40_v11 = vld [vmem:[#allocation3 + $0x20] sm:$0xff]  ;;  %v39_v12 = vld [vmem:[#allocation3 + $0x18] sm:$0xff]  ;;  %v38_v13 = vld [vmem:[#allocation3 + $0x10] sm:$0xff] }
   0xa   :  { %53 = vmatpush.xpose.msra.mxu0 %v50_v1  ;;  %120 = vmatpush.xpose.msra.mxu1 %v50_v1  ;;  %v37_v14 = vld [vmem:[#allocation3 + $0x8] sm:$0xff]  ;;  %v36_v15 = vld [vmem:[#allocation3] sm:$0xff] }
   0xb   :  { %v93_v24 = vld [vmem:[%s218_s2] sm:$0xff]  ;;  %v94_v28 = vld [vmem:[%s218_s2 + $0x8] sm:$0xff] }
   0xc   :  { %v105_v34 = vld [vmem:[%s217_s1] sm:$0xff]  ;;  %v106_v39 = vld [vmem:[%s217_s1 + $0x8] sm:$0xff] }
   0xe   :  { %54 = vmatpush.xpose.msra.mxu0 %v49_v2  ;;  %121 = vmatpush.xpose.msra.mxu1 %v49_v2 }
  0x12   :  { %55 = vmatpush.xpose.msra.mxu0 %v48_v3  ;;  %122 = vmatpush.xpose.msra.mxu1 %v48_v3 }
  0x16   :  { %56 = vmatpush.xpose.msra.mxu0 %v47_v4  ;;  %123 = vmatpush.xpose.msra.mxu1 %v47_v4 }
  0x1a   :  { %57 = vmatpush.xpose.msra.mxu0 %v46_v5  ;;  %124 = vmatpush.xpose.msra.mxu1 %v46_v5 }
  0x1e   :  { %58 = vmatpush.xpose.msra.mxu0 %v45_v6  ;;  %125 = vmatpush.xpose.msra.mxu1 %v45_v6 }
  0x22   :  { %59 = vmatpush.xpose.msra.mxu0 %v44_v7  ;;  %126 = vmatpush.xpose.msra.mxu1 %v44_v7 }
  0x26   :  { %60 = vmatpush.xpose.msra.mxu0 %v43_v8  ;;  %127 = vmatpush.xpose.msra.mxu1 %v43_v8 }
  0x2a   :  { %61 = vmatpush.xpose.msra.mxu0 %v42_v9  ;;  %128 = vmatpush.xpose.msra.mxu1 %v42_v9 }
  0x2e   :  { %62 = vmatpush.xpose.msra.mxu0 %v41_v10  ;;  %129 = vmatpush.xpose.msra.mxu1 %v41_v10 }
  0x32   :  { %63 = vmatpush.xpose.msra.mxu0 %v40_v11  ;;  %130 = vmatpush.xpose.msra.mxu1 %v40_v11 }
  0x36   :  { %64 = vmatpush.xpose.msra.mxu0 %v39_v12  ;;  %131 = vmatpush.xpose.msra.mxu1 %v39_v12 }
  0x3a   :  { %65 = vmatpush.xpose.msra.mxu0 %v38_v13  ;;  %132 = vmatpush.xpose.msra.mxu1 %v38_v13 }
  0x3e   :  { %66 = vmatpush.xpose.msra.mxu0 %v37_v14  ;;  %133 = vmatpush.xpose.msra.mxu1 %v37_v14 }
  0x42   :  { %67 = vmatpush.xpose.msra.mxu0 %v36_v15  ;;  %134 = vmatpush.xpose.msra.mxu1 %v36_v15 }
  0x45   :  { %68 = vmatmul.f32.vlgmr.msra.gmra.mxu0 %v36_v15  ;;  %71 = vmatmul.f32.vlgmr.msra.gmra.mxu1 %v37_v14 }
  0xc2   :  { %v69_v16 = vpop.f32.mrf.mxu0  ;;  %v72_v17 = vpop.f32.mrf.mxu1 }
  0xc3   :  { %v117_v18 = vadd.f32 -2.0, %v69_v16  ;;  %v118_v20 = vadd.f32 -2.0, %v72_v17 }
  0xc5   :  { %v77_v19 = vmul.f32 1.442695, %v117_v18  ;;  %v79_v21 = vmul.f32 1.442695, %v118_v20 }
  0xc7   :  { %138 = vpow2.f32 %v77_v19 }
  0xc8   :  { %140 = vpow2.f32 %v79_v21 }
  0xcd   :  { %v139_v22 = vpop.eup %138 }
  0xce   :  { %89 = vadd.xlane.f32.xlu0 %v139_v22  ;;  %v141_v23 = vpop.eup %140 }
  0xd6   :  { %91 = vadd.xlane.f32.xlu0 %v141_v23 }
 0x141   :  { %v90_v25 = vpop.xlane.xlu0 %89 }
 0x142   :  { %v95_v26 = vsub.f32 %v90_v25, %v93_v24 }
 0x144   :  { %v97_v27 = vmax.f32 %v95_v26, 1e-30 }
 0x146   :  { %142 = vlog2.f32 %v97_v27 }
 0x149   :  { %v92_v29 = vpop.xlane.xlu0 %91 }
 0x14a   :  { %v96_v30 = vsub.f32 %v92_v29, %v94_v28 }
 0x14c   :  { %v143_v31 = vpop.eup %142  ;;  %v98_v32 = vmax.f32 %v96_v30, 1e-30 }
 0x14d   :  { %v100_v33 = vmul.f32 0.6931472, %v143_v31 }
 0x14e   :  { %144 = vlog2.f32 %v98_v32 }
 0x14f   :  { %v103_v35 = vadd.f32 2.0, %v100_v33 }
 0x151   :  { %v107_v36 = vsub.f32 %v103_v35, %v105_v34 }
 0x153   :  { %110 = vst.msk [vmem:[%s219_s3] sm:$0xff] %vm109_vm0, %v107_v36 }
 0x154   :  { %v145_v37 = vpop.eup %144 }
 0x155   :  { %v102_v38 = vmul.f32 0.6931472, %v145_v37 }
 0x157   :  { %v104_v40 = vadd.f32 2.0, %v102_v38 }
 0x159   :  { %v108_v41 = vsub.f32 %v104_v40, %v106_v39 }
 0x15b   :  { %111 = vst.msk [vmem:[%s219_s3 + $0x8] sm:$0xff] %vm109_vm0, %v108_v41 }
 0x15c   :  { %116 = vsyncpa [#allocation4], 1 }

</bundles_post_ra>
